<compile_context>
chip_gen: v6e
topology: v6e:2x2x1
jax: 0.10.0
libtpu: 0.0.40
codegen_flags: <defaults>
</compile_context>

<pallas_src>
import jax
import jax.numpy as jnp
from jax.experimental import pallas as pl
from jax.experimental.pallas import tpu as pltpu

_MATMUL_DTYPE = jnp.bfloat16   # MXU operand dtype for the 3x3 convs


def _round_up(x, m):
    return (x + m - 1) // m * m


# ----------------------------- Pallas kernels ------------------------------ #

def _pool2_and_1x1_kernel(taps_ref, wt_ref, b_ref, pooled_ref, y_ref):
    """Fused MaxPool2d(2) + (b1|b2_reduce|b3_reduce) 1x1 conv + BN + ReLU.

    taps_ref : (4, Cin, tm) f32   -- the 4 pool taps
    wt_ref   : (Cout, Cin)  f32   -- BN-scale-folded, concat of 3 branches
    b_ref    : (Cout, 1)    f32
    pooled_ref : (Cin, tm)  f32   -- pooled activations (needed by branch b4)
    y_ref      : (Cout, tm) f32
    """
    pooled = jnp.max(taps_ref[...], axis=0)                       # (Cin, tm)
    pooled_ref[...] = pooled
    acc = jnp.dot(wt_ref[...], pooled, preferred_element_type=jnp.float32)
    y_ref[...] = jnp.maximum(acc + b_ref[...], 0.0).astype(y_ref.dtype)


def _pool3_and_1x1_kernel(taps_ref, wt_ref, b_ref, y_ref):
    """Fused MaxPool(3, stride=1, pad=1) + 1x1 conv + BN + ReLU (branch b4).

    taps_ref : (9, Cin, tm) f32 (padding taps carry -inf)
    wt_ref   : (Cout, Cin)  f32
    b_ref    : (Cout, 1)    f32
    y_ref    : (Cout, tm)   f32
    """
    pool4 = jnp.max(taps_ref[...], axis=0)                        # (Cin, tm)
    acc = jnp.dot(wt_ref[...], pool4, preferred_element_type=jnp.float32)
    y_ref[...] = jnp.maximum(acc + b_ref[...], 0.0).astype(y_ref.dtype)


def _conv_bn_relu_kernel(x_ref, wt_ref, b_ref, y_ref):
    """3x3 conv (im2col'd) + BN + ReLU as a single wide-contraction matmul.

    x_ref  : (9*Cin, tm) bf16   -- packed taps, order (ky, kx, cin)
    wt_ref : (Cout, 9*Cin) bf16 -- BN-scale-folded
    b_ref  : (Cout, 1) f32
    y_ref  : (Cout, tm) f32
    """
    acc = jnp.dot(wt_ref[...], x_ref[...], preferred_element_type=jnp.float32)
    y_ref[...] = jnp.maximum(acc + b_ref[...], 0.0).astype(y_ref.dtype)


# ------------------------------- tap builders ------------------------------- #
# x_t is always channel-major: (C, N, H, W); flattened spatial M = N*H*W.

def _taps_pool2x2_t(x_t):
    C, N, H, W = x_t.shape
    taps = [x_t[:, :, dy::2, dx::2].reshape(C, -1)
            for dy in range(2) for dx in range(2)]
    return jnp.stack(taps, axis=0)                                # (4, C, M')


def _taps_3x3_concat_t(x_t, pad_value=0.0):
    """3x3 / pad=1 taps packed along channels -> (9*C, M), order (ky, kx, c)."""
    C, N, H, W = x_t.shape
    xp = jnp.pad(x_t, ((0, 0), (0, 0), (1, 1), (1, 1)), constant_values=pad_value)
    taps = [xp[:, :, ky:ky + H, kx:kx + W].reshape(C, N * H * W)
            for ky in range(3) for kx in range(3)]
    return jnp.concatenate(taps, axis=0)                          # (9*C, M)


def _taps_3x3_stack_t(x_t, pad_value):
    """3x3 / pad=1 taps kept separate for max-pool -> (9, C, M)."""
    C, N, H, W = x_t.shape
    xp = jnp.pad(x_t, ((0, 0), (0, 0), (1, 1), (1, 1)), constant_values=pad_value)
    taps = [xp[:, :, ky:ky + H, kx:kx + W].reshape(C, N * H * W)
            for ky in range(3) for kx in range(3)]
    return jnp.stack(taps, axis=0)                                # (9, C, M)


# ------------------------------ kernel wrappers ----------------------------- #

def fused_pool2_1x1(x_t, wt, b, *, tm):
    taps = _taps_pool2x2_t(x_t)                                   # (4, Cin, M)
    K, Cin, M = taps.shape
    Cout = wt.shape[0]
    Mpad = _round_up(M, tm)
    if Mpad != M:
        taps = jnp.pad(taps, ((0, 0), (0, 0), (0, Mpad - M)))
    pooled, y = pl.pallas_call(
        _pool2_and_1x1_kernel,
        out_shape=(jax.ShapeDtypeStruct((Cin, Mpad), jnp.float32),
                   jax.ShapeDtypeStruct((Cout, Mpad), jnp.float32)),
        grid=(Mpad // tm,),
        in_specs=[
            pl.BlockSpec((K, Cin, tm), lambda i: (0, 0, i)),
            pl.BlockSpec((Cout, Cin), lambda i: (0, 0)),
            pl.BlockSpec((Cout, 1), lambda i: (0, 0)),
        ],
        out_specs=(
            pl.BlockSpec((Cin, tm), lambda i: (0, i)),
            pl.BlockSpec((Cout, tm), lambda i: (0, i)),
        ),
        compiler_params=pltpu.CompilerParams(dimension_semantics=("parallel",)),
    )(taps, wt, b)
    return pooled[:, :M], y[:, :M]


def fused_pool3_1x1(x_t, wt, b, *, tm):
    taps = _taps_3x3_stack_t(x_t, -jnp.inf)                       # (9, Cin, M)
    K, Cin, M = taps.shape
    Cout = wt.shape[0]
    Mpad = _round_up(M, tm)
    if Mpad != M:
        taps = jnp.pad(taps, ((0, 0), (0, 0), (0, Mpad - M)))
    y = pl.pallas_call(
        _pool3_and_1x1_kernel,
        out_shape=jax.ShapeDtypeStruct((Cout, Mpad), jnp.float32),
        grid=(Mpad // tm,),
        in_specs=[
            pl.BlockSpec((K, Cin, tm), lambda i: (0, 0, i)),
            pl.BlockSpec((Cout, Cin), lambda i: (0, 0)),
            pl.BlockSpec((Cout, 1), lambda i: (0, 0)),
        ],
        out_specs=pl.BlockSpec((Cout, tm), lambda i: (0, i)),
        compiler_params=pltpu.CompilerParams(dimension_semantics=("parallel",)),
    )(taps, wt, b)
    return y[:, :M]


def conv3x3_bn_relu(x_t, wt, b, *, tm, compute_dtype=_MATMUL_DTYPE):
    taps = _taps_3x3_concat_t(x_t).astype(compute_dtype)          # (9*Cin, M)
    KC, M = taps.shape
    Cout = wt.shape[0]
    Mpad = _round_up(M, tm)
    if Mpad != M:
        taps = jnp.pad(taps, ((0, 0), (0, Mpad - M)))
    y = pl.pallas_call(
        _conv_bn_relu_kernel,
        out_shape=jax.ShapeDtypeStruct((Cout, Mpad), jnp.float32),
        grid=(Mpad // tm,),
        in_specs=[
            pl.BlockSpec((KC, tm), lambda i: (0, i)),
            pl.BlockSpec((Cout, KC), lambda i: (0, 0)),
            pl.BlockSpec((Cout, 1), lambda i: (0, 0)),
        ],
        out_specs=pl.BlockSpec((Cout, tm), lambda i: (0, i)),
        compiler_params=pltpu.CompilerParams(dimension_semantics=("parallel",)),
    )(taps, wt.astype(compute_dtype), b)
    return y[:, :M]


# ------------------------------- parameters --------------------------------- #

def make_conv_bn(key, kh, kw, cin, cout, eps=1e-5):
    """Conv(kh,kw) + BN folded into (wt=(Cout, kh*kw*cin), bias=(Cout,1))."""
    kw_, kb, kg, kbeta, km, kv = jax.random.split(key, 6)
    w = 0.1 * jax.random.normal(kw_, (kh, kw, cin, cout), jnp.float32)   # HWIO
    b = 0.1 * jax.random.normal(kb, (cout,), jnp.float32)
    gamma = 1.0 + 0.1 * jax.random.normal(kg, (cout,), jnp.float32)
    beta = 0.1 * jax.random.normal(kbeta, (cout,), jnp.float32)
    mean = 0.1 * jax.random.normal(km, (cout,), jnp.float32)
    var = jnp.abs(jax.random.normal(kv, (cout,), jnp.float32)) + 0.5
    s = gamma * jax.lax.rsqrt(var + eps)
    t = (b - mean) * s + beta
    wt = (w.reshape(kh * kw * cin, cout) * s).T                   # fold BN scale
    return wt, t.reshape(cout, 1)


# --------------------------------- forward ---------------------------------- #

def down_forward(x_nchw, params, *, tm=None):
    N, Cin, H, W = x_nchw.shape
    Ho, Wo = H // 2, W // 2
    M = N * Ho * Wo
    if tm is None:
        # Lane-dim tile: multiple of 128, capped so blocks stay small even on
        # v7x's 64 MiB VMEM while leaving enough grid steps to double-buffer.
        tm = min(_round_up(M, 128), 512)

    x_t = jnp.transpose(x_nchw, (1, 0, 2, 3))                     # (Cin, N, H, W)

    # Concatenate the three 1x1-on-pooled branches into one weight matrix.
    wt1 = jnp.concatenate(
        [params["b1"][0], params["b2_reduce"][0], params["b3_reduce"][0]], axis=0)
    bb1 = jnp.concatenate(
        [params["b1"][1], params["b2_reduce"][1], params["b3_reduce"][1]], axis=0)

    pooled, y1 = fused_pool2_1x1(x_t, wt1, bb1, tm=tm)            # (Cin, M), (16, M)

    n1 = params["b1"][0].shape[0]
    nr2 = params["b2_reduce"][0].shape[0]
    nr3 = params["b3_reduce"][0].shape[0]
    b1 = y1[:n1]                                                  # (n1x1, M)
    r2 = y1[n1:n1 + nr2].reshape(nr2, N, Ho, Wo)
    r3 = y1[n1 + nr2:].reshape(nr3, N, Ho, Wo)
    pooled4d = pooled.reshape(Cin, N, Ho, Wo)

    # Branch 2: 1x1 reduce (done above) -> 3x3
    b2 = conv3x3_bn_relu(r2, *params["b2_conv"], tm=tm)

    # Branch 3: 1x1 reduce -> 3x3 -> 3x3
    t3 = conv3x3_bn_relu(r3, *params["b3_conv1"], tm=tm)
    b3 = conv3x3_bn_relu(t3.reshape(-1, N, Ho, Wo), *params["b3_conv2"], tm=tm)

    # Branch 4: MaxPool(3,1,1) + 1x1 conv, fused.
    b4 = fused_pool3_1x1(pooled4d, *params["b4"], tm=tm)

    out = jnp.concatenate([b1, b2, b3, b4], axis=0)               # (Ctot, M)
    Ctot = out.shape[0]
    return jnp.transpose(out.reshape(Ctot, N, Ho, Wo), (1, 0, 2, 3))   # NCHW


# ----------------------------------- main ----------------------------------- #

if __name__ == "__main__":
    key = jax.random.PRNGKey(0)
    in_channels, n1x1, n3x3_reduce, n3x3, n5x5_reduce, n5x5, pool_proj = 4, 8, 4, 8, 4, 8, 8

    keys = jax.random.split(key, 8)
    params = {
        "b1":        make_conv_bn(keys[0], 1, 1, in_channels, n1x1),
        "b2_reduce": make_conv_bn(keys[1], 1, 1, in_channels, n3x3_reduce),
        "b2_conv":   make_conv_bn(keys[2], 3, 3, n3x3_reduce, n3x3),
        "b3_reduce": make_conv_bn(keys[3], 1, 1, in_channels, n5x5_reduce),
        "b3_conv1":  make_conv_bn(keys[4], 3, 3, n5x5_reduce, n5x5),
        "b3_conv2":  make_conv_bn(keys[5], 3, 3, n5x5, n5x5),
        "b4":        make_conv_bn(keys[6], 1, 1, in_channels, pool_proj),
    }

    x = jax.random.normal(keys[7], (2, in_channels, 16, 16), jnp.float32)  # NCHW
    out = down_forward(x, params)
    jax.block_until_ready(out)
    assert out.shape == (2, n1x1 + n3x3 + n5x5 + pool_proj, 8, 8), out.shape
    assert bool(jnp.all(jnp.isfinite(out)))
    print("KERNEL_OK")
</pallas_src>

<mosaic_0001>
module attributes {stable_mosaic.version = 11 : i64} {
  func.func @_pool2_and_1x1_kernel(%arg0: i32, %arg1: memref<4x4x128xf32, #tpu.memory_space<vmem>>, %arg2: memref<16x4xf32, #tpu.memory_space<vmem>>, %arg3: memref<16x1xf32, #tpu.memory_space<vmem>>, %arg4: memref<4x128xf32, #tpu.memory_space<vmem>>, %arg5: memref<16x128xf32, #tpu.memory_space<vmem>>) attributes {dimension_semantics = [#tpu.dimension_semantics<parallel>], iteration_bounds = array<i64: 1>, scalar_prefetch = 0 : i64, scratch_operands = 0 : i64, tpu.core_type = #tpu.core_type<tc>, window_params = [{transform_indices = @transform_0, window_bounds = array<i64: 4, 4, 128>}, {pipeline_mode = #tpu.pipeline_mode<synchronous>, transform_indices = @transform_1, window_bounds = array<i64: 16, 4>}, {pipeline_mode = #tpu.pipeline_mode<synchronous>, transform_indices = @transform_2, window_bounds = array<i64: 16, 1>}, {transform_indices = @transform_3, window_bounds = array<i64: 4, 128>}, {transform_indices = @transform_4, window_bounds = array<i64: 16, 128>}]} {
    %c0 = arith.constant 0 : index
    %c0_0 = arith.constant 0 : index
    %c0_1 = arith.constant 0 : index
    %0 = vector.load %arg1[%c0, %c0_0, %c0_1] : memref<4x4x128xf32, #tpu.memory_space<vmem>>, vector<4x4x128xf32>
    %cst = arith.constant dense<0xFF800000> : vector<4x128xf32>
    %1 = vector.multi_reduction <maximumf>, %0, %cst [0] : vector<4x4x128xf32> to vector<4x128xf32>
    %c0_2 = arith.constant 0 : index
    %c0_3 = arith.constant 0 : index
    %2 = vector.load %arg4[%c0_2, %c0_3] : memref<4x128xf32, #tpu.memory_space<vmem>>, vector<4x128xf32>
    tpu.vector_store %arg4[%c0_2, %c0_3], %1 {strides = array<i32>} : memref<4x128xf32, #tpu.memory_space<vmem>>, vector<4x128xf32>,
    %c0_4 = arith.constant 0 : index
    %c0_5 = arith.constant 0 : index
    %3 = vector.load %arg2[%c0_4, %c0_5] : memref<16x4xf32, #tpu.memory_space<vmem>>, vector<16x4xf32>
    %cst_6 = arith.constant dense<0.000000e+00> : vector<16x128xf32>
    %4 = tpu.matmul %3, %1, %cst_6 {dimension_numbers = #tpu.dot_dimension_numbers<[1], [0], [0], [1], [0, 0, 1, 1], [], []>} : vector<16x4xf32>, vector<4x128xf32>, vector<16x128xf32> -> vector<16x128xf32>
    %c0_7 = arith.constant 0 : index
    %c0_8 = arith.constant 0 : index
    %5 = vector.load %arg3[%c0_7, %c0_8] : memref<16x1xf32, #tpu.memory_space<vmem>>, vector<16x1xf32>
    %6 = vector.broadcast %5 : vector<16x1xf32> to vector<16x128xf32>
    %7 = arith.addf %4, %6 : vector<16x128xf32>
    %cst_9 = arith.constant 0.000000e+00 : f32
    %8 = vector.broadcast %cst_9 : f32 to vector<16x128xf32>
    %9 = arith.maximumf %7, %8 : vector<16x128xf32>
    %c0_10 = arith.constant 0 : index
    %c0_11 = arith.constant 0 : index
    %10 = vector.load %arg5[%c0_10, %c0_11] : memref<16x128xf32, #tpu.memory_space<vmem>>, vector<16x128xf32>
    tpu.vector_store %arg5[%c0_10, %c0_11], %9 {strides = array<i32>} : memref<16x128xf32, #tpu.memory_space<vmem>>, vector<16x128xf32>,
    return
  }
  func.func @transform_0(%arg0: i32) -> (i32, i32, i32) {
    %c0_i32 = arith.constant 0 : i32
    %c0_i32_0 = arith.constant 0 : i32
    %c0_i32_1 = arith.constant 0 : i32
    return %c0_i32, %c0_i32_0, %arg0 : i32, i32, i32
  }
  func.func @transform_1(%arg0: i32) -> (i32, i32) {
    %c0_i32 = arith.constant 0 : i32
    %c0_i32_0 = arith.constant 0 : i32
    %c0_i32_1 = arith.constant 0 : i32
    return %c0_i32, %c0_i32_0 : i32, i32
  }
  func.func @transform_2(%arg0: i32) -> (i32, i32) {
    %c0_i32 = arith.constant 0 : i32
    %c0_i32_0 = arith.constant 0 : i32
    %c0_i32_1 = arith.constant 0 : i32
    return %c0_i32, %c0_i32_0 : i32, i32
  }
  func.func @transform_3(%arg0: i32) -> (i32, i32) {
    %c0_i32 = arith.constant 0 : i32
    %c0_i32_0 = arith.constant 0 : i32
    return %c0_i32, %arg0 : i32, i32
  }
  func.func @transform_4(%arg0: i32) -> (i32, i32) {
    %c0_i32 = arith.constant 0 : i32
    %c0_i32_0 = arith.constant 0 : i32
    return %c0_i32, %arg0 : i32, i32
  }
}

</mosaic_0001>

<bundles_post_ra>
// kernel: tpu_custom_call.1
= control target key start
LH: loop header
LB: loop body
LE: loop exit
PB: predicated region body
PF: predicated region fallthrough
CT: control target
= control target key end

     0   :  { %10 = vsyncpa [#allocation3], 0  ;;  %vm22_vm0 = vcmask 1043456   ;;  %vm45_vm1 = vcmask 31744   ;;  %s293_s0 = inlined_call_operand.vmem [shape: f32[4,4,128], index: 0, kind: input, shape index: {}]   ;;  %s294_s1 = inlined_call_operand.vmem [shape: f32[16,4], index: 1, kind: input, shape index: {}]   ;;  %s295_s2 = inlined_call_operand.vmem [shape: f32[16,1], index: 2, kind: input, shape index: {}]   ;;  %s296_s3 = inlined_call_operand.hbm [shape: f32[4,128], index: 3, kind: output, shape index: {0}]   ;;  %s297_s4 = inlined_call_operand.hbm [shape: f32[16,128], index: 4, kind: output, shape index: {1}]  }
   0x1   :  { %v18_v0 = vld [vmem:[%s293_s0] sm:$0xf]  ;;  %v19_v1 = vld [vmem:[%s293_s0 + $0x4] sm:$0xf]  ;;  %v20_v2 = vld [vmem:[%s293_s0 + $0x8] sm:$0xf] }
   0x2   :  { %v21_v3 = vld [vmem:[%s293_s0 + $0xc] sm:$0xf]  ;;  %v31_v4 = vld [vmem:[%s294_s1] sm:$0xff]  ;;  %v23_v5 = vsel %vm22_vm0, %v18_v0, -inf  ;;  %v24_v6 = vsel %vm22_vm0, %v19_v1, -inf  ;;  %v25_v7 = vsel %vm22_vm0, %v20_v2, -inf }
   0x3   :  { %v26_v8 = vsel %vm22_vm0, %v21_v3, -inf  ;;  %172 = vmatprep.mubr.msk.f32.mxu0 %vm45_vm1, %v31_v4  ;;  %v33_v9 = vld [vmem:[%s295_s2] sm:$0xff]  ;;  %v27_v10 = vmax.f32 %v23_v5, %v24_v6 }
   0x4   :  { %v28_v11 = vmax.f32 %v25_v7, %v26_v8 }
   0x5   :  { %11 = vsyncpa [#allocation5], 0  ;;  %v225_v12 = vmov 0   ;;  %v32_v14 = vld [vmem:[%s294_s1 + $0x8] sm:$0xff]  ;;  %s226_s30 = smov [#allocation2]  }
   0x6   :  { %180 = vset.pattern.permute.xlu0 %v225_v12  ;;  %v29_v13 = vmax.f32 %v27_v10, %v28_v11  ;;  %v34_v15 = vld [vmem:[%s295_s2 + $0x8] sm:$0xff]  ;;  %s140_s5 = sshll.u32 %s226_s30, 4  ;;  %s141_s5 = int_to_ptr.vmem [resolvable:$true] %s140_s5 }
   0x7   :  { %37 = vperm.xlu0 %180, %v33_v9   ;;  %s181_s6 = scalar_lea.vmem %s141_s5, 64  ;;  %p186_p1 = scmp.lt.s32.totalorder %s141_s5, %s141_s5 }
   0x8   :  { %170 = vmatprep.subr.msk.mxu0 %vm22_vm0, %v29_v13  ;;  %30 = vst [vmem:[#allocation2] sm:$0xf] %v29_v13  ;;  %p182_p0 = scmp.ne.s32.totalorder %s141_s5, %s181_s6  ;;  %p187_p2 = scmp.lt.s32.totalorder %s181_s6, %s181_s6 }
   0x9   :  { %171 = vmatpush3.msk.msra.mxu0 %vm22_vm0, %v29_v13 }
   0xa   :  { %173 = vmatmul.mubr.msk.f32.vlgmr.msra.gmra.mxu0 %vm45_vm1, %v32_v14  ;;  %p188_p3 = por %p187_p2, %p186_p1 }
   0xb   :  { %42 = vperm.xlu0 %180, %v34_v15  }
   0xc   :  { %p189_p4 = pnand %p188_p3, %p182_p0 }
   0xe   :  { %192 = shalt.err (!%p189_p4)
}
   0xf   :  { %143 = dma.vmem_to_hbm [thread:$0]  %s141_s5, 64, %s296_s3, [#allocation3]  }
  0x10   :  { %s227_s7 = smov [#allocation4]  }
  0x11   :  { %s149_s8 = sshll.u32 %s227_s7, 4  ;;  %s150_s8 = int_to_ptr.vmem [resolvable:$true] %s149_s8 }
  0x12   :  { %s201_s9 = scalar_lea.vmem %s150_s8, 256  ;;  %p206_p6 = scmp.lt.s32.totalorder %s150_s8, %s150_s8 }
  0x13   :  { %p202_p5 = scmp.ne.s32.totalorder %s150_s8, %s201_s9  ;;  %p207_p7 = scmp.lt.s32.totalorder %s201_s9, %s201_s9 }
  0x15   :  { %p208_p8 = por %p207_p7, %p206_p6 }
  0x17   :  { %p209_p9 = pnand %p208_p8, %p202_p5 }
  0x82   :  { %v38_v16 = vpop.permute.xlu0 %37 }
  0x86   :  { %v43_v17 = vpop.permute.xlu0 %42 }
  0xca   :  { %v174_v18 = vpop.f32.mrf.mxu0 }
  0xcb   :  { %v127_v19 = vadd.f32 %v174_v18, %v43_v17 }
  0xcc   :  { %v121_v20 = vpop.f32.mrf.mxu0 }
  0xcd   :  { %v131_v21 = vmax.f32 %v127_v19, 0.0  ;;  %v122_v22 = vadd.f32 %v121_v20, %v38_v16 }
  0xcf   :  { %133 = vst [vmem:[#allocation4 + $0x8] sm:$0xff] %v131_v21  ;;  %v130_v23 = vmax.f32 %v122_v22, 0.0 }
  0xd1   :  { %132 = vst [vmem:[#allocation4] sm:$0xff] %v130_v23 }
  0xd2   :  { %212 = shalt.err (!%p209_p9)
}
  0xd3   :  { %s228_s3 = smov 128   ;;  %s229_s10 = smov 8  }
  0xd4   :  { %155 = dma.vmem_to_hbm [thread:$0]  %s150_s8, 256, %s297_s4, [#allocation5], %s228_s3, %s228_s3, %s229_s10  }
  0xd5   :  { %221 = dma.done.wait [#allocation3], 64  }
  0xd6   :  { %222 = vsyncadd [#allocation3], 4294967232 }
  0xd7   :  { %223 = dma.done.wait [#allocation5], 256  }
  0xd8   :  { %224 = vsyncadd [#allocation5], 4294967040 }
  0xd9   :  { %162 = vsyncpa [#allocation3], 1 }
  0xda   :  { %163 = vsyncpa [#allocation5], 1 }

</bundles_post_ra>
